<compile_context>
chip_gen: v7x
topology: tpu7x:2x2x1
jax: 0.10.0
libtpu: 0.0.40
codegen_flags: <defaults>
</compile_context>

<pallas_src>
import functools

import jax
import jax.numpy as jnp
import numpy as np
from jax import lax
from jax.experimental import pallas as pl
from jax.experimental.pallas import tpu as pltpu

P_NEG = 1.0          # self._p_neg (hard-coded to 1 in __init__)
REG_SCALE = 0.01     # reg_scale constructor arg
FUNCTION = "logi"    # TODO(synk): `param.function` is not importable in the PyTorch source; default to 'logi'.

LANE = 128           # vreg lane width
ROW_ALIGN = 16       # row-tile alignment (covers bf16 (16,128) native tiling)
NUM_SPLITS = 2       # leading "parallel" grid axis -> one partial per TensorCore (v7x has 2 TCs)
DEFAULT_TILE_ROWS = 1024   # negative rows per grid step (see VMEM budget note below)


def _round_up(x, m):
    return (x + m - 1) // m * m


def _u_complex_loss_kernel(bn_true, tiles_per_split,
                           pos_ref, w_ref, neg_hn_ref, neg_tn_ref, lin_ref,
                           out_ref, acc_ref):
    c = pl.program_id(0)        # split index ("parallel"; one per TensorCore on v7x)
    i = pl.program_id(1)        # tile index within the split ("arbitrary" reduction axis)

    W = lin_ref[0]              # Linear(1,1) weight (scalar, SMEM)
    bias = lin_ref[1]           # Linear(1,1) bias   (scalar, SMEM)

    def load6(ref):
        # Per-component reads are cheap views into the VMEM block; upcast to f32.
        return tuple(ref[k].astype(jnp.float32) for k in range(6))

    def complex_score(parts):
        h_re, h_im, r_re, r_im, t_re, t_im = parts
        # Factored ComplEx score: 6 mul + 3 add per element (vs 8 mul + 3 add).
        s = r_re * (h_re * t_re + h_im * t_im) + r_im * (h_re * t_im - h_im * t_re)
        return jnp.sum(s, axis=-1, keepdims=True)       # [rows, 1]  (XLU lane reduce)

    def liner(x):
        y = x * W + bias
        if FUNCTION == "logi":
            y = jax.nn.sigmoid(y)
        return y

    # ---- init per-split accumulators -------------------------------------
    @pl.when(i == 0)
    def _():
        acc_ref[0] = jnp.float32(0.0)
        acc_ref[1] = jnp.float32(0.0)

    # ---- negative-sample tile (the dominant HBM traffic) ------------------
    t_rows = neg_hn_ref.shape[1]
    row0 = (c * tiles_per_split + i) * t_rows
    rid = row0 + lax.broadcasted_iota(jnp.int32, (t_rows, 1), 0)
    valid = rid < bn_true                                # mask padded rows

    f_hn = liner(complex_score(load6(neg_hn_ref)))       # [T, 1]
    f_tn = liner(complex_score(load6(neg_tn_ref)))       # [T, 1]
    acc_ref[0] = acc_ref[0] + jnp.sum(jnp.where(valid, jnp.square(f_hn), 0.0))
    acc_ref[1] = acc_ref[1] + jnp.sum(jnp.where(valid, jnp.square(f_tn), 0.0))

    # ---- finalize: flush this split's partials + tiny positive-triple terms
    @pl.when(i == tiles_per_split - 1)
    def _():
        pos_parts = load6(pos_ref)                       # 6 x [B, Dp]  (f32)
        f_prob = liner(complex_score(pos_parts))         # [B, 1]
        pos_fscore = jnp.sum(jnp.square(f_prob - w_ref[...]))
        pos_sq = jnp.float32(0.0)
        for p in pos_parts:                              # regularizer pieces
            pos_sq = pos_sq + jnp.sum(jnp.square(p))

        lane = lax.broadcasted_iota(jnp.int32, (8, LANE), 1)
        row = lax.broadcasted_iota(jnp.int32, (8, LANE), 0)
        vals = jnp.where(lane == 0, acc_ref[0],
               jnp.where(lane == 1, acc_ref[1],
               jnp.where(lane == 2, pos_fscore,
               jnp.where(lane == 3, pos_sq, jnp.float32(0.0)))))
        out_ref[...] = jnp.where(row == 0, vals, jnp.float32(0.0))


def u_complex_loss(pos, neg_hn, neg_tn, w, lin, *,
                   tile_rows=DEFAULT_TILE_ROWS, num_splits=NUM_SPLITS):
    """pos: [6,B,D] f32, neg_hn/neg_tn: [6,BN,D] (bf16 or f32), w: [B,1] f32, lin: [2] f32."""
    _, B, D = pos.shape
    BN = neg_hn.shape[1]
    N = BN // B

    # Lane-dense layout: pad D to a multiple of 128 with zeros (zeros change
    # neither the score sums nor the regularizer).
    Dp = _round_up(D, LANE)
    if Dp != D:
        pad_d = ((0, 0), (0, 0), (0, Dp - D))
        pos = jnp.pad(pos, pad_d)
        neg_hn = jnp.pad(neg_hn, pad_d)
        neg_tn = jnp.pad(neg_tn, pad_d)

    # Row tiling: T negative rows per grid step, split over `num_splits`
    # independent partial reductions.  Padded rows are masked in-kernel.
    T = min(tile_rows, _round_up(max(pl.cdiv(BN, num_splits), 1), ROW_ALIGN))
    tiles = pl.cdiv(BN, num_splits * T)
    BNp = num_splits * tiles * T
    if BNp != BN:
        pad_r = ((0, 0), (0, BNp - BN), (0, 0))
        neg_hn = jnp.pad(neg_hn, pad_r)
        neg_tn = jnp.pad(neg_tn, pad_r)

    kernel = functools.partial(_u_complex_loss_kernel, BN, tiles)

    out = pl.pallas_call(
        kernel,
        out_shape=jax.ShapeDtypeStruct((num_splits * 8, LANE), jnp.float32),
        grid=(num_splits, tiles),
        in_specs=[
            pl.BlockSpec((6, B, Dp), lambda c, i: (0, 0, 0)),               # pos (resident)
            pl.BlockSpec((B, 1), lambda c, i: (0, 0)),                      # w   (resident)
            pl.BlockSpec((6, T, Dp), lambda c, i: (0, c * tiles + i, 0)),   # neg_hn tile
            pl.BlockSpec((6, T, Dp), lambda c, i: (0, c * tiles + i, 0)),   # neg_tn tile
            pl.BlockSpec(memory_space=pltpu.MemorySpace.SMEM),              # lin = (W, b)
        ],
        out_specs=pl.BlockSpec((8, LANE), lambda c, i: (c, 0)),
        scratch_shapes=[pltpu.SMEM((2,), jnp.float32)],
        compiler_params=pltpu.CompilerParams(
            # Split axis is independent (-> both TCs on v7x); tile axis is a
            # serial accumulation.
            dimension_semantics=("parallel", "arbitrary"),
            # Budget: 2 neg inputs x 2 pipeline buffers x 6*T*Dp*2B (bf16)
            # ~= 12 MiB at T=1024, Dp=256 — well under 32 MiB scoped on every
            # generation (v7x has 64 MiB physical VMEM per TensorCore).
            vmem_limit_bytes=32 * 1024 * 1024,
        ),
    )(pos, w, neg_hn, neg_tn, lin)

    # Combine per-split partials (a handful of scalar ops, done in JAX so each
    # TensorCore only has to produce an independent partial sum).
    parts = out.reshape(num_splits, 8, LANE)[:, 0, :]
    sum_sq_hn = jnp.sum(parts[:, 0])                 # sum over all b,n of f_prob_hn^2
    sum_sq_tn = jnp.sum(parts[:, 1])
    pos_fscore = parts[0, 2]                         # sum_b (f_prob_b - w_b)^2
    pos_sq = parts[0, 3]                             # sum of squares of positive embeddings

    this_loss = ((sum_sq_tn / N + sum_sq_hn / N) / 2.0 * P_NEG + pos_fscore) / B
    regularizer = pos_sq / 2.0 / B
    return this_loss + REG_SCALE * regularizer


# ------------------------- plain-JAX glue / reference -------------------------

def xavier_uniform(key, shape):
    fan_out, fan_in = shape  # torch 2D: fan_in = size(1), fan_out = size(0)
    bound = float(np.sqrt(6.0 / (fan_in + fan_out)))
    return jax.random.uniform(key, shape, jnp.float32, -bound, bound)


def embed6(ent_re, ent_im, rel_re, rel_im, h, r, t):
    return jnp.stack([
        jnp.take(ent_re, h, axis=0),
        jnp.take(ent_im, h, axis=0),
        jnp.take(rel_re, r, axis=0),
        jnp.take(rel_im, r, axis=0),
        jnp.take(ent_re, t, axis=0),
        jnp.take(ent_im, t, axis=0),
    ], axis=0)


def reference_loss(pos, neg_hn, neg_tn, w, lin, B, N):
    W, b = lin[0], lin[1]

    def score(e6):
        h_re, h_im, r_re, r_im, t_re, t_im = [x.astype(jnp.float32) for x in e6]
        return jnp.sum(h_re * t_re * r_re + h_im * t_im * r_re
                       + h_re * t_im * r_im - h_im * t_re * r_im,
                       axis=-1, keepdims=True)

    def liner(x):
        y = x * W + b
        return jax.nn.sigmoid(y) if FUNCTION == "logi" else y

    f_prob = jnp.squeeze(liner(score(pos)), -1)                              # [B]
    f_prob_hn = jnp.squeeze(liner(score(neg_hn)), -1).reshape(B, N)          # [B, N]
    f_prob_tn = jnp.squeeze(liner(score(neg_tn)), -1).reshape(B, N)          # [B, N]
    f_score = jnp.square(f_prob - w)
    f_score_hn = jnp.mean(jnp.square(f_prob_hn), axis=1)
    f_score_tn = jnp.mean(jnp.square(f_prob_tn), axis=1)
    this_loss = jnp.sum((f_score_tn + f_score_hn) / 2.0 * P_NEG + f_score) / B
    reg = jnp.sum(jnp.square(pos.astype(jnp.float32))) / 2.0 / B
    return this_loss + REG_SCALE * reg


if __name__ == "__main__":
    num_cons, num_rels, dim = 32, 8, 32
    batch_size, neg_per_positive = 8, 4
    B, N, D = batch_size, neg_per_positive, dim

    key = jax.random.PRNGKey(0)
    ks = jax.random.split(key, 16)

    # Parameters (deterministic, matches __init__ shapes)
    ent_re = xavier_uniform(ks[0], (num_cons, dim))
    ent_im = xavier_uniform(ks[1], (num_cons, dim))
    rel_re = xavier_uniform(ks[2], (num_rels, dim))
    rel_im = xavier_uniform(ks[3], (num_rels, dim))
    lin = jnp.concatenate([
        0.3 * jax.random.normal(ks[4], (1,), jnp.float32),   # Linear(1,1) weight
        0.3 * jax.random.normal(ks[5], (1,), jnp.float32),   # Linear(1,1) bias
    ]).astype(jnp.float32)

    # Forward inputs
    h = jax.random.randint(ks[6], (B,), 0, num_cons)
    r = jax.random.randint(ks[7], (B,), 0, num_rels)
    t = jax.random.randint(ks[8], (B,), 0, num_cons)
    w = jax.random.uniform(ks[9], (B,), jnp.float32)
    n_hn = jax.random.randint(ks[10], (B, N), 0, num_cons)
    n_rel_hn = jax.random.randint(ks[11], (B, N), 0, num_rels)
    n_t = jax.random.randint(ks[12], (B, N), 0, num_cons)
    n_h = jax.random.randint(ks[13], (B, N), 0, num_cons)
    n_rel_tn = jax.random.randint(ks[14], (B, N), 0, num_rels)
    n_tn = jax.random.randint(ks[15], (B, N), 0, num_cons)

    # Embedding gathers (glue).  The dominant negative bundles are carried in
    # bf16 to halve HBM traffic; positives stay f32 (regularizer path).
    pos = embed6(ent_re, ent_im, rel_re, rel_im, h, r, t)                               # [6, B, D] f32
    neg_hn = embed6(ent_re, ent_im, rel_re, rel_im,
                    n_hn.reshape(-1), n_rel_hn.reshape(-1), n_t.reshape(-1)
                    ).astype(jnp.bfloat16)                                              # [6, B*N, D] bf16
    neg_tn = embed6(ent_re, ent_im, rel_re, rel_im,
                    n_h.reshape(-1), n_rel_tn.reshape(-1), n_tn.reshape(-1)
                    ).astype(jnp.bfloat16)                                              # [6, B*N, D] bf16
    w2d = w.reshape(B, 1)

    loss = u_complex_loss(pos, neg_hn, neg_tn, w2d, lin)
    loss = jax.block_until_ready(loss)

    ref = reference_loss(pos, neg_hn, neg_tn, w, lin, B, N)
    np.testing.assert_allclose(np.asarray(loss), np.asarray(ref), rtol=1e-4, atol=1e-5)

    print("KERNEL_OK")
</pallas_src>

<mosaic_0001>
module attributes {stable_mosaic.version = 11 : i64} {
  func.func @_u_complex_loss_kernel(%arg0: i32, %arg1: i32, %arg2: memref<6x8x128xf32, #tpu.memory_space<vmem>>, %arg3: memref<8x1xf32, #tpu.memory_space<vmem>>, %arg4: memref<6x16x128xbf16, #tpu.memory_space<vmem>>, %arg5: memref<6x16x128xbf16, #tpu.memory_space<vmem>>, %arg6: memref<2xf32, #tpu.memory_space<smem>>, %arg7: memref<8x128xf32, #tpu.memory_space<vmem>>, %arg8: memref<2xf32, #tpu.memory_space<smem>>) attributes {dimension_semantics = [#tpu.dimension_semantics<parallel>, #tpu.dimension_semantics<arbitrary>], iteration_bounds = array<i64: 2, 1>, scalar_prefetch = 0 : i64, scratch_operands = 1 : i64, tpu.core_type = #tpu.core_type<tc>, window_params = [{pipeline_mode = #tpu.pipeline_mode<synchronous>, transform_indices = @transform_0, window_bounds = array<i64: 6, 8, 128>}, {pipeline_mode = #tpu.pipeline_mode<synchronous>, transform_indices = @transform_1, window_bounds = array<i64: 8, 1>}, {transform_indices = @transform_2, window_bounds = array<i64: 6, 16, 128>}, {transform_indices = @transform_3, window_bounds = array<i64: 6, 16, 128>}, {transform_indices = @transform_4, window_bounds = array<i64: 2>}, {transform_indices = @transform_5, window_bounds = array<i64: 8, 128>}]} {
    %c0 = arith.constant 0 : index
    %0 = memref.load %arg6[%c0] : memref<2xf32, #tpu.memory_space<smem>>
    %c1 = arith.constant 1 : index
    %1 = memref.load %arg6[%c1] : memref<2xf32, #tpu.memory_space<smem>>
    %c0_i32 = arith.constant 0 : i32
    %2 = arith.cmpi eq, %arg1, %c0_i32 : i32
    %3 = arith.extui %2 : i1 to i32
    %c0_i32_0 = arith.constant 0 : i32
    %4 = arith.cmpi ne, %3, %c0_i32_0 : i32
    scf.if %4 {
      %cst_46 = arith.constant 0.000000e+00 : f32
      %c0_47 = arith.constant 0 : index
      %112 = memref.load %arg8[%c0_47] : memref<2xf32, #tpu.memory_space<smem>>
      memref.store %cst_46, %arg8[%c0_47] : memref<2xf32, #tpu.memory_space<smem>>
      %cst_48 = arith.constant 0.000000e+00 : f32
      %c1_49 = arith.constant 1 : index
      %113 = memref.load %arg8[%c1_49] : memref<2xf32, #tpu.memory_space<smem>>
      memref.store %cst_48, %arg8[%c1_49] : memref<2xf32, #tpu.memory_space<smem>>
    } else {
    }
    %c1_i32 = arith.constant 1 : i32
    %5 = arith.muli %arg0, %c1_i32 : i32
    %6 = arith.addi %5, %arg1 : i32
    %c16_i32 = arith.constant 16 : i32
    %7 = arith.muli %6, %c16_i32 : i32
    %8 = tpu.iota {dimensions = array<i32: 0>} : vector<16x1xi32>
    %9 = vector.broadcast %7 : i32 to vector<16x1xi32>
    %10 = arith.addi %9, %8 : vector<16x1xi32>
    %c32_i32 = arith.constant 32 : i32
    %11 = vector.broadcast %c32_i32 : i32 to vector<16x1xi32>
    %12 = arith.cmpi slt, %10, %11 : vector<16x1xi32>
    %c0_1 = arith.constant 0 : index
    %c0_2 = arith.constant 0 : index
    %c0_3 = arith.constant 0 : index
    %13 = vector.load %arg4[%c0_1, %c0_2, %c0_3] : memref<6x16x128xbf16, #tpu.memory_space<vmem>>, vector<1x16x128xbf16>
    %14 = vector.shape_cast %13 : vector<1x16x128xbf16> to vector<16x128xbf16>
    %15 = arith.extf %14 : vector<16x128xbf16> to vector<16x128xf32>
    %c1_4 = arith.constant 1 : index
    %c0_5 = arith.constant 0 : index
    %c0_6 = arith.constant 0 : index
    %16 = vector.load %arg4[%c1_4, %c0_5, %c0_6] : memref<6x16x128xbf16, #tpu.memory_space<vmem>>, vector<1x16x128xbf16>
    %17 = vector.shape_cast %16 : vector<1x16x128xbf16> to vector<16x128xbf16>
    %18 = arith.extf %17 : vector<16x128xbf16> to vector<16x128xf32>
    %c2 = arith.constant 2 : index
    %c0_7 = arith.constant 0 : index
    %c0_8 = arith.constant 0 : index
    %19 = vector.load %arg4[%c2, %c0_7, %c0_8] : memref<6x16x128xbf16, #tpu.memory_space<vmem>>, vector<1x16x128xbf16>
    %20 = vector.shape_cast %19 : vector<1x16x128xbf16> to vector<16x128xbf16>
    %21 = arith.extf %20 : vector<16x128xbf16> to vector<16x128xf32>
    %c3 = arith.constant 3 : index
    %c0_9 = arith.constant 0 : index
    %c0_10 = arith.constant 0 : index
    %22 = vector.load %arg4[%c3, %c0_9, %c0_10] : memref<6x16x128xbf16, #tpu.memory_space<vmem>>, vector<1x16x128xbf16>
    %23 = vector.shape_cast %22 : vector<1x16x128xbf16> to vector<16x128xbf16>
    %24 = arith.extf %23 : vector<16x128xbf16> to vector<16x128xf32>
    %c4 = arith.constant 4 : index
    %c0_11 = arith.constant 0 : index
    %c0_12 = arith.constant 0 : index
    %25 = vector.load %arg4[%c4, %c0_11, %c0_12] : memref<6x16x128xbf16, #tpu.memory_space<vmem>>, vector<1x16x128xbf16>
    %26 = vector.shape_cast %25 : vector<1x16x128xbf16> to vector<16x128xbf16>
    %27 = arith.extf %26 : vector<16x128xbf16> to vector<16x128xf32>
    %c5 = arith.constant 5 : index
    %c0_13 = arith.constant 0 : index
    %c0_14 = arith.constant 0 : index
    %28 = vector.load %arg4[%c5, %c0_13, %c0_14] : memref<6x16x128xbf16, #tpu.memory_space<vmem>>, vector<1x16x128xbf16>
    %29 = vector.shape_cast %28 : vector<1x16x128xbf16> to vector<16x128xbf16>
    %30 = arith.extf %29 : vector<16x128xbf16> to vector<16x128xf32>
    %31 = arith.mulf %15, %27 : vector<16x128xf32>
    %32 = arith.mulf %18, %30 : vector<16x128xf32>
    %33 = arith.addf %31, %32 : vector<16x128xf32>
    %34 = arith.mulf %21, %33 : vector<16x128xf32>
    %35 = arith.mulf %15, %30 : vector<16x128xf32>
    %36 = arith.mulf %18, %27 : vector<16x128xf32>
    %37 = arith.subf %35, %36 : vector<16x128xf32>
    %38 = arith.mulf %24, %37 : vector<16x128xf32>
    %39 = arith.addf %34, %38 : vector<16x128xf32>
    %cst = arith.constant dense<0.000000e+00> : vector<16xf32>
    %40 = vector.multi_reduction <add>, %39, %cst [1] : vector<16x128xf32> to vector<16xf32>
    %41 = vector.shape_cast %40 : vector<16xf32> to vector<16x1xf32>
    %42 = vector.broadcast %0 : f32 to vector<16x1xf32>
    %43 = arith.mulf %41, %42 : vector<16x1xf32>
    %44 = vector.broadcast %1 : f32 to vector<16x1xf32>
    %45 = arith.addf %43, %44 : vector<16x1xf32>
    %46 = arith.negf %45 : vector<16x1xf32>
    %47 = math.exp %46 : vector<16x1xf32>
    %cst_15 = arith.constant 1.000000e+00 : f32
    %48 = vector.broadcast %cst_15 : f32 to vector<16x1xf32>
    %49 = arith.addf %48, %47 : vector<16x1xf32>
    %50 = arith.divf %48, %49 : vector<16x1xf32>
    %c0_16 = arith.constant 0 : index
    %c0_17 = arith.constant 0 : index
    %c0_18 = arith.constant 0 : index
    %51 = vector.load %arg5[%c0_16, %c0_17, %c0_18] : memref<6x16x128xbf16, #tpu.memory_space<vmem>>, vector<1x16x128xbf16>
    %52 = vector.shape_cast %51 : vector<1x16x128xbf16> to vector<16x128xbf16>
    %53 = arith.extf %52 : vector<16x128xbf16> to vector<16x128xf32>
    %c1_19 = arith.constant 1 : index
    %c0_20 = arith.constant 0 : index
    %c0_21 = arith.constant 0 : index
    %54 = vector.load %arg5[%c1_19, %c0_20, %c0_21] : memref<6x16x128xbf16, #tpu.memory_space<vmem>>, vector<1x16x128xbf16>
    %55 = vector.shape_cast %54 : vector<1x16x128xbf16> to vector<16x128xbf16>
    %56 = arith.extf %55 : vector<16x128xbf16> to vector<16x128xf32>
    %c2_22 = arith.constant 2 : index
    %c0_23 = arith.constant 0 : index
    %c0_24 = arith.constant 0 : index
    %57 = vector.load %arg5[%c2_22, %c0_23, %c0_24] : memref<6x16x128xbf16, #tpu.memory_space<vmem>>, vector<1x16x128xbf16>
    %58 = vector.shape_cast %57 : vector<1x16x128xbf16> to vector<16x128xbf16>
    %59 = arith.extf %58 : vector<16x128xbf16> to vector<16x128xf32>
    %c3_25 = arith.constant 3 : index
    %c0_26 = arith.constant 0 : index
    %c0_27 = arith.constant 0 : index
    %60 = vector.load %arg5[%c3_25, %c0_26, %c0_27] : memref<6x16x128xbf16, #tpu.memory_space<vmem>>, vector<1x16x128xbf16>
    %61 = vector.shape_cast %60 : vector<1x16x128xbf16> to vector<16x128xbf16>
    %62 = arith.extf %61 : vector<16x128xbf16> to vector<16x128xf32>
    %c4_28 = arith.constant 4 : index
    %c0_29 = arith.constant 0 : index
    %c0_30 = arith.constant 0 : index
    %63 = vector.load %arg5[%c4_28, %c0_29, %c0_30] : memref<6x16x128xbf16, #tpu.memory_space<vmem>>, vector<1x16x128xbf16>
    %64 = vector.shape_cast %63 : vector<1x16x128xbf16> to vector<16x128xbf16>
    %65 = arith.extf %64 : vector<16x128xbf16> to vector<16x128xf32>
    %c5_31 = arith.constant 5 : index
    %c0_32 = arith.constant 0 : index
    %c0_33 = arith.constant 0 : index
    %66 = vector.load %arg5[%c5_31, %c0_32, %c0_33] : memref<6x16x128xbf16, #tpu.memory_space<vmem>>, vector<1x16x128xbf16>
    %67 = vector.shape_cast %66 : vector<1x16x128xbf16> to vector<16x128xbf16>
    %68 = arith.extf %67 : vector<16x128xbf16> to vector<16x128xf32>
    %69 = arith.mulf %53, %65 : vector<16x128xf32>
    %70 = arith.mulf %56, %68 : vector<16x128xf32>
    %71 = arith.addf %69, %70 : vector<16x128xf32>
    %72 = arith.mulf %59, %71 : vector<16x128xf32>
    %73 = arith.mulf %53, %68 : vector<16x128xf32>
    %74 = arith.mulf %56, %65 : vector<16x128xf32>
    %75 = arith.subf %73, %74 : vector<16x128xf32>
    %76 = arith.mulf %62, %75 : vector<16x128xf32>
    %77 = arith.addf %72, %76 : vector<16x128xf32>
    %cst_34 = arith.constant dense<0.000000e+00> : vector<16xf32>
    %78 = vector.multi_reduction <add>, %77, %cst_34 [1] : vector<16x128xf32> to vector<16xf32>
    %79 = vector.shape_cast %78 : vector<16xf32> to vector<16x1xf32>
    %80 = vector.broadcast %0 : f32 to vector<16x1xf32>
    %81 = arith.mulf %79, %80 : vector<16x1xf32>
    %82 = vector.broadcast %1 : f32 to vector<16x1xf32>
    %83 = arith.addf %81, %82 : vector<16x1xf32>
    %84 = arith.negf %83 : vector<16x1xf32>
    %85 = math.exp %84 : vector<16x1xf32>
    %cst_35 = arith.constant 1.000000e+00 : f32
    %86 = vector.broadcast %cst_35 : f32 to vector<16x1xf32>
    %87 = arith.addf %86, %85 : vector<16x1xf32>
    %88 = arith.divf %86, %87 : vector<16x1xf32>
    %c0_36 = arith.constant 0 : index
    %89 = memref.load %arg8[%c0_36] : memref<2xf32, #tpu.memory_space<smem>>
    %90 = arith.mulf %50, %50 : vector<16x1xf32>
    %cst_37 = arith.constant 0.000000e+00 : f32
    %91 = vector.broadcast %cst_37 : f32 to vector<16x1xf32>
    %92 = arith.select %12, %90, %91 : vector<16x1xi1>, vector<16x1xf32>
    %93 = vector.shape_cast %92 : vector<16x1xf32> to vector<1x16x1xf32>
    %cst_38 = arith.constant dense<0.000000e+00> : vector<1xf32>
    %94 = vector.multi_reduction <add>, %93, %cst_38 [1, 2] : vector<1x16x1xf32> to vector<1xf32>
    %95 = vector.shape_cast %94 : vector<1xf32> to vector<1x1x1xf32>
    %96 = vector.extract %95[0, 0, 0] : f32 from vector<1x1x1xf32>
    %97 = arith.addf %89, %96 : f32
    %c0_39 = arith.constant 0 : index
    %98 = memref.load %arg8[%c0_39] : memref<2xf32, #tpu.memory_space<smem>>
    memref.store %97, %arg8[%c0_39] : memref<2xf32, #tpu.memory_space<smem>>
    %c1_40 = arith.constant 1 : index
    %99 = memref.load %arg8[%c1_40] : memref<2xf32, #tpu.memory_space<smem>>
    %100 = arith.mulf %88, %88 : vector<16x1xf32>
    %cst_41 = arith.constant 0.000000e+00 : f32
    %101 = vector.broadcast %cst_41 : f32 to vector<16x1xf32>
    %102 = arith.select %12, %100, %101 : vector<16x1xi1>, vector<16x1xf32>
    %103 = vector.shape_cast %102 : vector<16x1xf32> to vector<1x16x1xf32>
    %cst_42 = arith.constant dense<0.000000e+00> : vector<1xf32>
    %104 = vector.multi_reduction <add>, %103, %cst_42 [1, 2] : vector<1x16x1xf32> to vector<1xf32>
    %105 = vector.shape_cast %104 : vector<1xf32> to vector<1x1x1xf32>
    %106 = vector.extract %105[0, 0, 0] : f32 from vector<1x1x1xf32>
    %107 = arith.addf %99, %106 : f32
    %c1_43 = arith.constant 1 : index
    %108 = memref.load %arg8[%c1_43] : memref<2xf32, #tpu.memory_space<smem>>
    memref.store %107, %arg8[%c1_43] : memref<2xf32, #tpu.memory_space<smem>>
    %c0_i32_44 = arith.constant 0 : i32
    %109 = arith.cmpi eq, %arg1, %c0_i32_44 : i32
    %110 = arith.extui %109 : i1 to i32
    %c0_i32_45 = arith.constant 0 : i32
    %111 = arith.cmpi ne, %110, %c0_i32_45 : i32
    scf.if %111 {
      %c0_46 = arith.constant 0 : index
      %c0_47 = arith.constant 0 : index
      %c0_48 = arith.constant 0 : index
      %112 = vector.load %arg2[%c0_46, %c0_47, %c0_48] : memref<6x8x128xf32, #tpu.memory_space<vmem>>, vector<1x8x128xf32>
      %113 = vector.shape_cast %112 : vector<1x8x128xf32> to vector<8x128xf32>
      %c1_49 = arith.constant 1 : index
      %c0_50 = arith.constant 0 : index
      %c0_51 = arith.constant 0 : index
      %114 = vector.load %arg2[%c1_49, %c0_50, %c0_51] : memref<6x8x128xf32, #tpu.memory_space<vmem>>, vector<1x8x128xf32>
      %115 = vector.shape_cast %114 : vector<1x8x128xf32> to vector<8x128xf32>
      %c2_52 = arith.constant 2 : index
      %c0_53 = arith.constant 0 : index
      %c0_54 = arith.constant 0 : index
      %116 = vector.load %arg2[%c2_52, %c0_53, %c0_54] : memref<6x8x128xf32, #tpu.memory_space<vmem>>, vector<1x8x128xf32>
      %117 = vector.shape_cast %116 : vector<1x8x128xf32> to vector<8x128xf32>
      %c3_55 = arith.constant 3 : index
      %c0_56 = arith.constant 0 : index
      %c0_57 = arith.constant 0 : index
      %118 = vector.load %arg2[%c3_55, %c0_56, %c0_57] : memref<6x8x128xf32, #tpu.memory_space<vmem>>, vector<1x8x128xf32>
      %119 = vector.shape_cast %118 : vector<1x8x128xf32> to vector<8x128xf32>
      %c4_58 = arith.constant 4 : index
      %c0_59 = arith.constant 0 : index
      %c0_60 = arith.constant 0 : index
      %120 = vector.load %arg2[%c4_58, %c0_59, %c0_60] : memref<6x8x128xf32, #tpu.memory_space<vmem>>, vector<1x8x128xf32>
      %121 = vector.shape_cast %120 : vector<1x8x128xf32> to vector<8x128xf32>
      %c5_61 = arith.constant 5 : index
      %c0_62 = arith.constant 0 : index
      %c0_63 = arith.constant 0 : index
      %122 = vector.load %arg2[%c5_61, %c0_62, %c0_63] : memref<6x8x128xf32, #tpu.memory_space<vmem>>, vector<1x8x128xf32>
      %123 = vector.shape_cast %122 : vector<1x8x128xf32> to vector<8x128xf32>
      %124 = arith.mulf %113, %121 : vector<8x128xf32>
      %125 = arith.mulf %115, %123 : vector<8x128xf32>
      %126 = arith.addf %124, %125 : vector<8x128xf32>
      %127 = arith.mulf %117, %126 : vector<8x128xf32>
      %128 = arith.mulf %113, %123 : vector<8x128xf32>
      %129 = arith.mulf %115, %121 : vector<8x128xf32>
      %130 = arith.subf %128, %129 : vector<8x128xf32>
      %131 = arith.mulf %119, %130 : vector<8x128xf32>
      %132 = arith.addf %127, %131 : vector<8x128xf32>
      %cst_64 = arith.constant dense<0.000000e+00> : vector<8xf32>
      %133 = vector.multi_reduction <add>, %132, %cst_64 [1] : vector<8x128xf32> to vector<8xf32>
      %134 = vector.shape_cast %133 : vector<8xf32> to vector<8x1xf32>
      %135 = vector.broadcast %0 : f32 to vector<8x1xf32>
      %136 = arith.mulf %134, %135 : vector<8x1xf32>
      %137 = vector.broadcast %1 : f32 to vector<8x1xf32>
      %138 = arith.addf %136, %137 : vector<8x1xf32>
      %139 = arith.negf %138 : vector<8x1xf32>
      %140 = math.exp %139 : vector<8x1xf32>
      %cst_65 = arith.constant 1.000000e+00 : f32
      %141 = vector.broadcast %cst_65 : f32 to vector<8x1xf32>
      %142 = arith.addf %141, %140 : vector<8x1xf32>
      %143 = arith.divf %141, %142 : vector<8x1xf32>
      %c0_66 = arith.constant 0 : index
      %c0_67 = arith.constant 0 : index
      %144 = vector.load %arg3[%c0_66, %c0_67] : memref<8x1xf32, #tpu.memory_space<vmem>>, vector<8x1xf32>
      %145 = arith.subf %143, %144 : vector<8x1xf32>
      %146 = arith.mulf %145, %145 : vector<8x1xf32>
      %147 = vector.shape_cast %146 : vector<8x1xf32> to vector<1x8x1xf32>
      %cst_68 = arith.constant dense<0.000000e+00> : vector<1xf32>
      %148 = vector.multi_reduction <add>, %147, %cst_68 [1, 2] : vector<1x8x1xf32> to vector<1xf32>
      %149 = vector.shape_cast %148 : vector<1xf32> to vector<1x1x1xf32>
      %150 = vector.extract %149[0, 0, 0] : f32 from vector<1x1x1xf32>
      %151 = arith.mulf %113, %113 : vector<8x128xf32>
      %152 = vector.shape_cast %151 : vector<8x128xf32> to vector<1x8x128xf32>
      %cst_69 = arith.constant dense<0.000000e+00> : vector<1xf32>
      %153 = vector.multi_reduction <add>, %152, %cst_69 [1, 2] : vector<1x8x128xf32> to vector<1xf32>
      %154 = vector.shape_cast %153 : vector<1xf32> to vector<1x1x1xf32>
      %155 = vector.extract %154[0, 0, 0] : f32 from vector<1x1x1xf32>
      %cst_70 = arith.constant 0.000000e+00 : f32
      %156 = arith.addf %cst_70, %155 : f32
      %157 = arith.mulf %115, %115 : vector<8x128xf32>
      %158 = vector.shape_cast %157 : vector<8x128xf32> to vector<1x8x128xf32>
      %cst_71 = arith.constant dense<0.000000e+00> : vector<1xf32>
      %159 = vector.multi_reduction <add>, %158, %cst_71 [1, 2] : vector<1x8x128xf32> to vector<1xf32>
      %160 = vector.shape_cast %159 : vector<1xf32> to vector<1x1x1xf32>
      %161 = vector.extract %160[0, 0, 0] : f32 from vector<1x1x1xf32>
      %162 = arith.addf %156, %161 : f32
      %163 = arith.mulf %117, %117 : vector<8x128xf32>
      %164 = vector.shape_cast %163 : vector<8x128xf32> to vector<1x8x128xf32>
      %cst_72 = arith.constant dense<0.000000e+00> : vector<1xf32>
      %165 = vector.multi_reduction <add>, %164, %cst_72 [1, 2] : vector<1x8x128xf32> to vector<1xf32>
      %166 = vector.shape_cast %165 : vector<1xf32> to vector<1x1x1xf32>
      %167 = vector.extract %166[0, 0, 0] : f32 from vector<1x1x1xf32>
      %168 = arith.addf %162, %167 : f32
      %169 = arith.mulf %119, %119 : vector<8x128xf32>
      %170 = vector.shape_cast %169 : vector<8x128xf32> to vector<1x8x128xf32>
      %cst_73 = arith.constant dense<0.000000e+00> : vector<1xf32>
      %171 = vector.multi_reduction <add>, %170, %cst_73 [1, 2] : vector<1x8x128xf32> to vector<1xf32>
      %172 = vector.shape_cast %171 : vector<1xf32> to vector<1x1x1xf32>
      %173 = vector.extract %172[0, 0, 0] : f32 from vector<1x1x1xf32>
      %174 = arith.addf %168, %173 : f32
      %175 = arith.mulf %121, %121 : vector<8x128xf32>
      %176 = vector.shape_cast %175 : vector<8x128xf32> to vector<1x8x128xf32>
      %cst_74 = arith.constant dense<0.000000e+00> : vector<1xf32>
      %177 = vector.multi_reduction <add>, %176, %cst_74 [1, 2] : vector<1x8x128xf32> to vector<1xf32>
      %178 = vector.shape_cast %177 : vector<1xf32> to vector<1x1x1xf32>
      %179 = vector.extract %178[0, 0, 0] : f32 from vector<1x1x1xf32>
      %180 = arith.addf %174, %179 : f32
      %181 = arith.mulf %123, %123 : vector<8x128xf32>
      %182 = vector.shape_cast %181 : vector<8x128xf32> to vector<1x8x128xf32>
      %cst_75 = arith.constant dense<0.000000e+00> : vector<1xf32>
      %183 = vector.multi_reduction <add>, %182, %cst_75 [1, 2] : vector<1x8x128xf32> to vector<1xf32>
      %184 = vector.shape_cast %183 : vector<1xf32> to vector<1x1x1xf32>
      %185 = vector.extract %184[0, 0, 0] : f32 from vector<1x1x1xf32>
      %186 = arith.addf %180, %185 : f32
      %187 = tpu.iota {dimensions = array<i32: 1>} : vector<8x128xi32>
      %188 = tpu.iota {dimensions = array<i32: 0>} : vector<8x128xi32>
      %c0_i32_76 = arith.constant 0 : i32
      %189 = vector.broadcast %c0_i32_76 : i32 to vector<8x128xi32>
      %190 = arith.cmpi eq, %187, %189 : vector<8x128xi32>
      %c0_77 = arith.constant 0 : index
      %191 = memref.load %arg8[%c0_77] : memref<2xf32, #tpu.memory_space<smem>>
      %c1_i32_78 = arith.constant 1 : i32
      %192 = vector.broadcast %c1_i32_78 : i32 to vector<8x128xi32>
      %193 = arith.cmpi eq, %187, %192 : vector<8x128xi32>
      %c1_79 = arith.constant 1 : index
      %194 = memref.load %arg8[%c1_79] : memref<2xf32, #tpu.memory_space<smem>>
      %c2_i32 = arith.constant 2 : i32
      %195 = vector.broadcast %c2_i32 : i32 to vector<8x128xi32>
      %196 = arith.cmpi eq, %187, %195 : vector<8x128xi32>
      %c3_i32 = arith.constant 3 : i32
      %197 = vector.broadcast %c3_i32 : i32 to vector<8x128xi32>
      %198 = arith.cmpi eq, %187, %197 : vector<8x128xi32>
      %cst_80 = arith.constant 0.000000e+00 : f32
      %199 = vector.broadcast %186 : f32 to vector<8x128xf32>
      %200 = vector.broadcast %cst_80 : f32 to vector<8x128xf32>
      %201 = arith.select %198, %199, %200 : vector<8x128xi1>, vector<8x128xf32>
      %202 = vector.broadcast %150 : f32 to vector<8x128xf32>
      %203 = arith.select %196, %202, %201 : vector<8x128xi1>, vector<8x128xf32>
      %204 = vector.broadcast %194 : f32 to vector<8x128xf32>
      %205 = arith.select %193, %204, %203 : vector<8x128xi1>, vector<8x128xf32>
      %206 = vector.broadcast %191 : f32 to vector<8x128xf32>
      %207 = arith.select %190, %206, %205 : vector<8x128xi1>, vector<8x128xf32>
      %c0_i32_81 = arith.constant 0 : i32
      %208 = vector.broadcast %c0_i32_81 : i32 to vector<8x128xi32>
      %209 = arith.cmpi eq, %188, %208 : vector<8x128xi32>
      %cst_82 = arith.constant 0.000000e+00 : f32
      %210 = vector.broadcast %cst_82 : f32 to vector<8x128xf32>
      %211 = arith.select %209, %207, %210 : vector<8x128xi1>, vector<8x128xf32>
      %c0_83 = arith.constant 0 : index
      %c0_84 = arith.constant 0 : index
      %212 = vector.load %arg7[%c0_83, %c0_84] : memref<8x128xf32, #tpu.memory_space<vmem>>, vector<8x128xf32>
      tpu.vector_store %arg7[%c0_83, %c0_84], %211 {strides = array<i32>} : memref<8x128xf32, #tpu.memory_space<vmem>>, vector<8x128xf32>,
    } else {
    }
    return
  }
  func.func @transform_0(%arg0: i32, %arg1: i32) -> (i32, i32, i32) {
    %c0_i32 = arith.constant 0 : i32
    %c0_i32_0 = arith.constant 0 : i32
    %c0_i32_1 = arith.constant 0 : i32
    %c0_i32_2 = arith.constant 0 : i32
    return %c0_i32, %c0_i32_0, %c0_i32_1 : i32, i32, i32
  }
  func.func @transform_1(%arg0: i32, %arg1: i32) -> (i32, i32) {
    %c0_i32 = arith.constant 0 : i32
    %c0_i32_0 = arith.constant 0 : i32
    %c0_i32_1 = arith.constant 0 : i32
    return %c0_i32, %c0_i32_0 : i32, i32
  }
  func.func @transform_2(%arg0: i32, %arg1: i32) -> (i32, i32, i32) {
    %c1_i32 = arith.constant 1 : i32
    %0 = arith.muli %arg0, %c1_i32 : i32
    %1 = arith.addi %0, %arg1 : i32
    %c0_i32 = arith.constant 0 : i32
    %c0_i32_0 = arith.constant 0 : i32
    %c0_i32_1 = arith.constant 0 : i32
    return %c0_i32, %1, %c0_i32_0 : i32, i32, i32
  }
  func.func @transform_3(%arg0: i32, %arg1: i32) -> (i32, i32, i32) {
    %c1_i32 = arith.constant 1 : i32
    %0 = arith.muli %arg0, %c1_i32 : i32
    %1 = arith.addi %0, %arg1 : i32
    %c0_i32 = arith.constant 0 : i32
    %c0_i32_0 = arith.constant 0 : i32
    %c0_i32_1 = arith.constant 0 : i32
    return %c0_i32, %1, %c0_i32_0 : i32, i32, i32
  }
  func.func @transform_4(%arg0: i32, %arg1: i32) -> i32 {
    %c0_i32 = arith.constant 0 : i32
    %c0_i32_0 = arith.constant 0 : i32
    return %c0_i32 : i32
  }
  func.func @transform_5(%arg0: i32, %arg1: i32) -> (i32, i32) {
    %c0_i32 = arith.constant 0 : i32
    %c0_i32_0 = arith.constant 0 : i32
    return %arg0, %c0_i32 : i32, i32
  }
}

</mosaic_0001>

<bundles_post_ra>
// kernel: tpu_custom_call.1
= control target key start
LH: loop header
LB: loop body
LE: loop exit
PB: predicated region body
PF: predicated region fallthrough
CT: control target
= control target key end

     0   :  { %s1578_s0 = inlined_call_operand.hbm [shape: f32[6,8,128], index: 0, kind: input, shape index: {}]   ;;  %s1579_s1 = inlined_call_operand.vmem [shape: f32[8,1], index: 1, kind: input, shape index: {}]   ;;  %s1580_s2 = inlined_call_operand.hbm [shape: bf16[6,32,128], index: 2, kind: input, shape index: {}]   ;;  %s1581_s3 = inlined_call_operand.hbm [shape: bf16[6,32,128], index: 3, kind: input, shape index: {}]   ;;  %s1582_s4 = inlined_call_operand.vmem [shape: f32[2], index: 4, kind: input, shape index: {}]   ;;  %s1583_s5 = inlined_call_operand.hbm [shape: f32[16,128], index: 5, kind: output, shape index: {}]  }
   0x1   :  { %1590 = sst [smem:[#allocation23_spill]] %s1578_s0 }
   0x2   :  { %1591 = sst [smem:[#allocation24_spill]] %s1580_s2 }
   0x3   :  { %1592 = sst [smem:[#allocation25_spill]] %s1582_s4 }
   0x4   :  { %10 = vsyncpa [#allocation4], 0 }
   0x5   :  { %11 = vsyncpa [#allocation8], 0 }
   0x6   :  { %13 = vsyncpa [#allocation8 + $0x1], 0 }
   0x7   :  { %14 = vsyncpa [#allocation6], 0 }
   0x8   :  { %15 = vsyncpa [#allocation5], 0 }
   0x9   :  { %17 = vsyncpa [#allocation5 + $0x1], 0  ;;  %s1289_s18 = smov 0   ;;  %s1291_s19 = smov 0  }
   0xa   :  { %s1293_s20 = smov 0   ;;  %s1295_s21 = smov 0  }
   0xb   :  { %s1297_s22 = smov 0   ;;  %s1299_s23 = smov 0  }
   0xc LB: > { %s1320_s24 = sadd.s32 4294967295, %s1240_s23   ;;  %s848_s25 = sadd.s32 4294967294, %s1240_s23   ;;  %s1240_s23 = sphi %s1299_s23, %s23_s23   ;;  %s1236_s22 = sphi %s1297_s22, %s1617_s22   ;;  %s1232_s21 = sphi %s1295_s21, %s1616_s21   ;;  %s1228_s20 = sphi %s1293_s20, %s1615_s20   ;;  %s1224_s19 = sphi %s1291_s19, %s1614_s19   ;;  %s1220_s18 = sphi %s1289_s18, %s1613_s18  }
   0xd   : > { %s35_s26 = sadd.s32 1, %s1236_s22  ;;  %s86_s27 = sadd.s32 1, %s1228_s20 }
   0xe   : > { %p37_p0 = scmp.ge.s32.totalorder %s35_s26, 2  ;;  %p93_p1 = scmp.ne.s32.totalorder %s1228_s20, %s1224_s19 }
   0xf   : > { %p94_p2 = scmp.eq.s32.totalorder %s1240_s23, 0  ;;  %p99_p3 = scmp.ne.s32.totalorder %s1224_s19, %s1220_s18 }
  0x10   : > { %s1619_s26 = smov (%p37_p0, %s35_s26), 0  ;;  %p1584_p5 = scmp.eq.s32.totalorder %s1320_s24, 0 }
  0x11   : > { %1593 = sst [smem:[#allocation22_spill]] %s1619_s26  ;;  %p1332_p4 = por %p94_p2, %p93_p1 }
  0x12   : > { %s83_s29 = ssub.s32 %s1236_s22, %s1619_s26  ;;  %p172_p6 = scmp.eq.s32.totalorder %s1320_s24, 1 }
  0x13   : > { %s1594_s28 = scalar_select %p1332_p4, 1, 0 }
  0x14   : > { %p84_p7 = scmp.eq.s32.totalorder %s83_s29, 0  ;;  %p1342_p8 = por %p1584_p5, %p99_p3 }
  0x15   : > { %p1346_p9 = por %p172_p6, %p93_p1  ;;  %p178_p10 = scmp.eq.s32.totalorder %s848_s25, 1 }
  0x16   : > { %s1595_s30 = scalar_select %p1342_p8, 1, 0 }
  0x17   : > { %s1596_s6 = scalar_select %p1346_p9, 1, 0 }
  0x18   : > { %s1351_s7 = scalar_select %p84_p7, %s1228_s20, %s86_s27  }
  0x19   : > { %p1353_p11 = por %p178_p10, %p99_p3  ;;  %p849_p12 = scmp.ge.s32.totalorder %s1240_s23, 1 }
  0x1a   : > { %p185_p13 = scmp.lt.s32.totalorder %s1240_s23, 3  ;;  %s1242_s10 = smov [#allocation3]  }
  0x1b   : > { %s1597_s8 = scalar_select %p1353_p11, 1, 0 }
  0x1c   : > { %p1359_p0 = pnand %p849_p12, %p185_p13  ;;  %s197_s11 = sshll.u32 %s1242_s10, 4  ;;  %s198_s11 = int_to_ptr.vmem [resolvable:$true] %s197_s11 }
  0x1d   : > { %s1599_s4 = sld [smem:[#allocation25_spill]]  ;;  %s1601_s0 = sld [smem:[#allocation23_spill]] }
  0x1e   : > { %s1598_s9 = scalar_select %p1359_p0, 1, 0 }
  0x1f   : > { %p1007_p1 = pneg %p1359_p0 }
  0x21   : > { %p1370_p2 = pnand %p1007_p1, %p1584_p5 }
  0x23   : > { %s214_s14 = sshll.u32 %s1599_s4, 4  ;;  %s1107_s25 = scalar_lea.hbm %s1601_s0, 768  ;;  %s1374_s14 = int_to_ptr.vmem [resolvable:$true] %s214_s14 }
  0x24   : > { %p1108_p3 = scmp.ne.s32.totalorder %s1601_s0, %s1107_s25  ;;  %p1109_p6 = pneg %p1370_p2 }
  0x25   : > { %p1114_p12 = scmp.lt.u32.totalorder %s1107_s25, %s1601_s0 }
  0x26   : > { %p1110_p7 = pnand %p1109_p6, %p1108_p3 }
  0x28   : > { %p1111_p10 = pneg %p1110_p7 }
  0x2a   : > { %p1116_p13 = pnand %p1114_p12, %p1111_p10 }
  0x2c   : > { %1119 = shalt.err (!%p1116_p13)
}
  0x2d   : > { %s1120_s13 = scalar_lea.vmem %s198_s11, 768  ;;  %p1128_p9 = scmp.lt.s32.totalorder %s198_s11, %s198_s11 }
  0x2e   : > { %p1121_p1 = scmp.ne.s32.totalorder %s198_s11, %s1120_s13  ;;  %p1129_p8 = scmp.lt.s32.totalorder %s1120_s13, %s1120_s13 }
  0x30   : > { %p1123_p5 = pnand %p1121_p1, %p1109_p6  ;;  %p1130_p0 = por %p1129_p8, %p1128_p9 }
  0x32   : > { %p1124_p11 = pneg %p1123_p5 }
  0x34   : > { %p1131_p4 = pnand %p1130_p0, %p1124_p11 }
  0x36   : > { %1134 = shalt.err (!%p1131_p4)
}
  0x37   : > { %s1243_s16 = smov 128   ;;  %s1244_s17 = smov 8  }
  0x38   : > { %1010 = dma.hbm_to_vmem [thread:$0]  (!%p1370_p2), %s1601_s0, 768, %s198_s11, [#allocation4], %s1243_s16, %s1243_s16, %s1244_s17  }
  0x39   : > { %s1135_s29 = scalar_lea.vmem %s1374_s14, 16  ;;  %p1143_p4 = scmp.lt.s32.totalorder %s1374_s14, %s1374_s14 }
  0x3a   : > { %p1136_p3 = scmp.ne.s32.totalorder %s1374_s14, %s1135_s29  ;;  %p1144_p9 = scmp.lt.s32.totalorder %s1135_s29, %s1135_s29 }
  0x3c   : > { %p1138_p5 = pnand %p1136_p3, %p1109_p6  ;;  %p1145_p11 = por %p1144_p9, %p1143_p4 }
  0x3e   : > { %p1139_p8 = pneg %p1138_p5 }
  0x40   : > { %p1146_p0 = pnand %p1145_p11, %p1139_p8 }
  0x42   : > { %1149 = shalt.err (!%p1146_p0)
}
  0x43   : > { %s1245_s10 = smov [#allocation10]   ;;  %p852_p7 = scmp.ge.s32.totalorder %s1240_s23, 2 }
  0x44   : > { %1013 = dma.vmem_to_smem (!%p1370_p2), %s1374_s14, 16, %s1245_s10, [#allocation6]  }
  0x45   : > { %221 = sbr.rel (%p852_p7) target bundleno = 103 (0x67), region = 28 }
  0x4c   : > { %s225_s11 = sand.u32 1, %s1240_s23   ;;  %s227_s12 = sand.u32 1, %s1228_s20  }
  0x4d   : > { %s958_s13 = smul.u32 48, %s227_s12  ;;  %s898_s15 = sshll.u32 %s1236_s22, 7 }
  0x4e   : > { %p1602_p6 = scmp.ne.s32.totalorder %s1594_s28, 0  ;;  %s1603_s2 = sld [smem:[#allocation24_spill]] }
  0x4f   : > { %s1246_s27 = smov 256   ;;  %s229_s10 = scalar_lea.vmem [#allocation7], %s958_s13 }
  0x50   : > { %s983_s14 = scalar_select %p1602_p6, [#allocation0], [#allocation16] }
  0x51   : > { %984 = sst [smem:[#allocation13]] (%p1602_p6), %s1246_s27  ;;  %s249_s0 = sshll.u32 %s229_s10, 4  ;;  %s250_s0 = int_to_ptr.vmem [resolvable:$true] %s249_s0 }
  0x52   : > { %s241_s29 = sld [smem:[%s983_s14]]   ;;  %s1247_s4 = smov 128  }
  0x53   : > { %985 = sst [smem:[#allocation13 + $0x1]] (%p1602_p6), %s1247_s4  ;;  %s1248_s12 = smov 2  }
  0x54   : > { %s236_s25 = scalar_lea.hbm %s1603_s2, %s898_s15  ;;  %986 = sst [smem:[#allocation13 + $0x2]] (%p1602_p6), %s1248_s12 }
  0x55   : > { %s1249_s26 = smov 64   ;;  %s1250_s17 = smov 4  }
  0x56   : > { %987 = sst [smem:[#allocation13 + $0x3]] (%p1602_p6), %s1249_s26  ;;  %s226_s27 = scalar_lea.sflag [#allocation8], %s225_s11 }
  0x57   : > { %988 = sst [smem:[#allocation13 + $0x4]] (%p1602_p6), %s1249_s26  ;;  %s1251_s2 = smov [#allocation12]  }
  0x58   : > { %s855_s16 = sshll.u32 %s241_s29, 26  ;;  %989 = sst [smem:[#allocation13 + $0x5]] (%p1602_p6), %s1250_s17 }
  0x59   : > { %s856_s14 = sadd.s32 134217728, %s855_s16 }
  0x5a   : > { %990 = dma.general (%p1602_p6), %s236_s25, 768, %s250_s0, %s226_s27, %s1251_s2, [#allocation13], %s856_s14, 0  }
  0x5b   : > { %s283_s12 = scalar_lea.hbm %s1581_s3, %s898_s15  ;;  %s276_s29 = scalar_lea.vmem [#allocation9], %s958_s13 }
  0x5c   : > { %s991_s26 = scalar_select %p1602_p6, [#allocation0], [#allocation17] }
  0x5d   : > { %s296_s17 = sshll.u32 %s276_s29, 4  ;;  %s1252_s11 = smov 256   ;;  %s297_s17 = int_to_ptr.vmem [resolvable:$true] %s296_s17 }
  0x5e   : > { %s288_s16 = sld [smem:[%s991_s26]]   ;;  %s1253_s0 = smov 128  }
  0x5f   : > { %992 = sst [smem:[#allocation15]] (%p1602_p6), %s1252_s11  ;;  %s1254_s2 = smov 2  }
  0x60   : > { %993 = sst [smem:[#allocation15 + $0x1]] (%p1602_p6), %s1253_s0  ;;  %s1255_s25 = smov 64  }
  0x61   : > { %994 = sst [smem:[#allocation15 + $0x2]] (%p1602_p6), %s1254_s2  ;;  %s1256_s13 = smov 4  }
  0x62   : > { %995 = sst [smem:[#allocation15 + $0x3]] (%p1602_p6), %s1255_s25  ;;  %s1257_s10 = smov [#allocation14]  }
  0x63   : > { %996 = sst [smem:[#allocation15 + $0x4]] (%p1602_p6), %s1255_s25 }
  0x64   : > { %s859_s15 = sshll.u32 %s288_s16, 26  ;;  %997 = sst [smem:[#allocation15 + $0x5]] (%p1602_p6), %s1256_s13 }
  0x65   : > { %s860_s14 = sadd.s32 134217728, %s859_s15 }
  0x66   : > { %998 = dma.general (%p1602_p6), %s283_s12, 768, %s297_s17, %s226_s27, %s1257_s10, [#allocation15], %s860_s14, 0  }
  0x67 PF: > { %p1604_p2 = scmp.ne.s32.totalorder %s1598_s9, 0 }
  0x68   : > { %p1605_p10 = scmp.eq.s32.totalorder (!%p1604_p2), %s1320_s24, 0 }
  0x69   : > { %321 = sbr.rel (%p1604_p2) target bundleno = 569 (0x239), region = 40 }
  0x70   : > { %1203 = dma.done.wait (%p1605_p10), [#allocation4], 768   ;;  %p1606_p12 = pmov %p1605_p10 }
  0x71   : > { %s327_s4 = sand.u32 1, %s1320_s24   ;;  %s1460_s26 = sand.u32 1, %s1224_s19  }
  0x72   : > { %1205 = vsyncadd (%p1606_p12), [#allocation4], 4294966528  ;;  %s960_s29 = smul.u32 48, %s1460_s26  ;;  %s328_s28 = scalar_lea.sflag [#allocation8], %s327_s4 }
  0x73   : > { %p1607_p13 = scmp.ne.s32.totalorder %s1595_s30, 0 }
  0x74   : > { %s331_s27 = scalar_lea.vmem [#allocation7], %s960_s29 }
  0x75   : > { %1207 = dma.done.wait (%p1607_p13), %s328_s28, 1536  }
  0x76   : > { %1209 = vsyncadd (%p1607_p13), %s328_s28, 4294965760  ;;  %s340_s9 = scalar_lea.vmem [#allocation9], %s960_s29  ;;  %p1608_p1 = pmov %p1605_p10 }
  0x78   : > { %1211 = dma.done.wait (%p1608_p1), [#allocation6], 16   ;;  %p1609_p3 = pmov %p1608_p1 }
  0x7a   : > { %1213 = vsyncadd (%p1609_p3), [#allocation6], 4294967280 }
  0x7b   : > { %349 = sfence }
  0x7c   : > { %v925_v0 = vld [vmem:[%s340_s9] sm:$0xff]   ;;  %v953_v1 = vld [vmem:[%s340_s9 + $0x8] sm:$0xff]   ;;  %v954_v2 = vld [vmem:[%s340_s9 + $0x10] sm:$0xff]   ;;  %s381_s24 = sld [smem:[#allocation10]]  ;;  %s865_s30 = sld [smem:[#allocation10 + $0x1]]  ;;  %vm542_vm2 = vcmask 7168  }
  0x7d   : > { %v926_v3 = vunpack.c.l.bf16 %v925_v0  ;;  %v930_v4 = vunpack.c.l.bf16 %v953_v1  ;;  %v934_v5 = vunpack.c.l.bf16 %v954_v2  ;;  %v955_v6 = vld [vmem:[%s340_s9 + $0x18] sm:$0xff]   ;;  %v956_v7 = vld [vmem:[%s340_s9 + $0x20] sm:$0xff]   ;;  %v957_v8 = vld [vmem:[%s340_s9 + $0x28] sm:$0xff]   ;;  %v927_v9 = vunpack.c.h.bf16 %v925_v0  ;;  %s866_s12 = sshll.u32 %s1232_s21, 4  ;;  %s864_s9 = sshll.u32 %s1460_s26, 3 }
  0x7e   : > { %v938_v10 = vunpack.c.l.bf16 %v955_v6  ;;  %v942_v11 = vunpack.c.l.bf16 %v956_v7  ;;  %v946_v12 = vunpack.c.l.bf16 %v957_v8  ;;  %v901_v13 = vld [vmem:[%s331_s27] sm:$0xff]   ;;  %v948_v14 = vld [vmem:[%s331_s27 + $0x8] sm:$0xff]   ;;  %v1471_v15 = vld [vmem:[%s331_s27 + $0x10] sm:$0xff]   ;;  %v931_v16 = vunpack.c.h.bf16 %v953_v1  ;;  %s376_s17 = scalar_lea.vmem [#allocation11], %s864_s9  ;;  %p1610_p8 = scmp.ne.s32.totalorder %s1596_s6, 0 }
  0x7f   : > { %v902_v17 = vunpack.c.l.bf16 %v901_v13  ;;  %v906_v18 = vunpack.c.l.bf16 %v948_v14  ;;  %v910_v19 = vunpack.c.l.bf16 %v1471_v15  ;;  %v1474_v20 = vld [vmem:[%s331_s27 + $0x18] sm:$0xff]   ;;  %v951_v21 = vld [vmem:[%s331_s27 + $0x20] sm:$0xff]   ;;  %v952_v22 = vld [vmem:[%s331_s27 + $0x28] sm:$0xff]   ;;  %v935_v23 = vunpack.c.h.bf16 %v954_v2  ;;  %s723_s16 = sshll.u32 %s376_s17, 4  ;;  %s1531_s16 = int_to_ptr.vmem [resolvable:$true] %s723_s16 }
  0x80   : > { %v499_v24 = vmul.f32 %v942_v11, %v926_v3  ;;  %v501_v25 = vmul.f32 %v946_v12, %v930_v4  ;;  %v507_v26 = vmul.f32 %v946_v12, %v926_v3  ;;  %v509_v27 = vmul.f32 %v942_v11, %v930_v4  ;;  %v581_v48 = vld [vmem:[#allocation3] sm:$0xff]  ;;  %v583_v53 = vld [vmem:[#allocation3 + $0x8] sm:$0xff] }
  0x81   : > { %v914_v28 = vunpack.c.l.bf16 %v1474_v20  ;;  %v918_v29 = vunpack.c.l.bf16 %v951_v21  ;;  %v922_v30 = vunpack.c.l.bf16 %v952_v22  ;;  %v939_v31 = vunpack.c.h.bf16 %v955_v6  ;;  %v1477_v54 = vld [vmem:[#allocation3 + $0x20] sm:$0xff]  ;;  %v1479_v55 = vld [vmem:[#allocation3 + $0x28] sm:$0xff] }
  0x82   : > { %v503_v32 = vadd.f32 %v501_v25, %v499_v24  ;;  %v511_v33 = vsub.f32 %v507_v26, %v509_v27  ;;  %v943_v34 = vunpack.c.h.bf16 %v956_v7  ;;  %v947_v35 = vunpack.c.h.bf16 %v957_v8 }
  0x83   : > { %v430_v36 = vmul.f32 %v918_v29, %v902_v17  ;;  %v432_v37 = vmul.f32 %v922_v30, %v906_v18  ;;  %v438_v38 = vmul.f32 %v922_v30, %v902_v17  ;;  %v440_v39 = vmul.f32 %v918_v29, %v906_v18 }
  0x84   : > { %v505_v40 = vmul.f32 %v934_v5, %v503_v32  ;;  %v513_v41 = vmul.f32 %v938_v10, %v511_v33  ;;  %v500_v42 = vmul.f32 %v943_v34, %v927_v9  ;;  %v502_v43 = vmul.f32 %v947_v35, %v931_v16 }
  0x85   : > { %v434_v44 = vadd.f32 %v432_v37, %v430_v36  ;;  %v442_v45 = vsub.f32 %v438_v38, %v440_v39  ;;  %v508_v46 = vmul.f32 %v947_v35, %v927_v9  ;;  %v510_v47 = vmul.f32 %v943_v34, %v931_v16  ;;  %v1485_v9 = vld [vmem:[#allocation3 + $0x10] sm:$0xff] }
  0x86   : > { %v515_v49 = vadd.f32 %v513_v41, %v505_v40  ;;  %v504_v50 = vadd.f32 %v502_v43, %v500_v42  ;;  %v903_v51 = vunpack.c.h.bf16 %v901_v13  ;;  %v907_v52 = vunpack.c.h.bf16 %v948_v14 }
  0x87   : > { %v436_v56 = vmul.f32 %v910_v19, %v434_v44  ;;  %v444_v57 = vmul.f32 %v914_v28, %v442_v45  ;;  %v512_v58 = vsub.f32 %v508_v46, %v510_v47  ;;  %v911_v59 = vunpack.c.h.bf16 %v1471_v15  ;;  %v1489_v15 = vld [vmem:[#allocation3 + $0x18] sm:$0xff] }
  0x88   : > { %517 = vadd.xlane.f32.xlu1 %v515_v49  ;;  %v506_v60 = vmul.f32 %v935_v23, %v504_v50  ;;  %v915_v61 = vunpack.c.h.bf16 %v1474_v20  ;;  %v919_v62 = vunpack.c.h.bf16 %v951_v21  ;;  %v923_v63 = vunpack.c.h.bf16 %v952_v22 }
  0x89   : > { %v446_v0 = vadd.f32 %v444_v57, %v436_v56  ;;  %v514_v1 = vmul.f32 %v939_v31, %v512_v58  ;;  %v592_v2 = vmul.f32 %v1477_v54, %v581_v48  ;;  %v593_v3 = vmul.f32 %v1479_v55, %v583_v53 }
  0x8a   : > { %v431_v4 = vmul.f32 %v919_v62, %v903_v51  ;;  %v433_v5 = vmul.f32 %v923_v63, %v907_v52  ;;  %v439_v6 = vmul.f32 %v923_v63, %v903_v51  ;;  %v441_v7 = vmul.f32 %v919_v62, %v907_v52 }
  0x8b   : > { %448 = vadd.xlane.f32.xlu0 %v446_v0  ;;  %v516_v8 = vadd.f32 %v514_v1, %v506_v60  ;;  %v594_v10 = vadd.f32 %v593_v3, %v592_v2  ;;  %v596_v11 = vmul.f32 %v1479_v55, %v581_v48  ;;  %v597_v12 = vmul.f32 %v1477_v54, %v583_v53 }
  0x8c   : > { %v435_v13 = vadd.f32 %v433_v5, %v431_v4  ;;  %v443_v14 = vsub.f32 %v439_v6, %v441_v7  ;;  %v635_v23 = vmul.f32 %v583_v53, %v583_v53  ;;  %v624_v24 = vmul.f32 %v581_v48, %v581_v48 }
  0x8d   : > { %519 = vadd.xlane.f32.xlu1 %v516_v8  ;;  %v598_v16 = vsub.f32 %v596_v11, %v597_v12  ;;  %v595_v19 = vmul.f32 %v594_v10, %v1485_v9  ;;  %v452_v26 = vstv %s381_s24  ;;  %v455_v28 = vstv %s865_s30 }
  0x8e   : > { %v437_v17 = vmul.f32 %v911_v59, %v435_v13  ;;  %v445_v18 = vmul.f32 %v915_v61, %v443_v14  ;;  %v393_v49 = vlaneseq  ;;  %v396_v56 = vstv %s866_s12  ;;  %v611_v13 = vld [vmem:[%s1579_s1] sm:$0xff]  ;;  %s895_s12 = sshll.u32 %s1232_s21, 7  ;;  %s710_s21 = scalar_lea.sflag [#allocation5], %s1460_s26 }
  0x8f   : > { %v599_v20 = vmul.f32 %v598_v16, %v1489_v15  ;;  %v646_v14 = vmul.f32 %v1485_v9, %v1485_v9 }
  0x90   : > { %v447_v21 = vadd.f32 %v445_v18, %v437_v17  ;;  %v1495_v53 = vshrl.u32 %v393_v49, 7 }
  0x91   : > { %v600_v22 = vadd.f32 %v599_v20, %v595_v19  ;;  %636 = vadd.xlane.f32.xlu1 %v635_v23 }
  0x92   : > { %450 = vadd.xlane.f32.xlu0 %v447_v21  ;;  %v395_v59 = vadd.s32 8, %v1495_v53  ;;  %v397_v61 = vadd.s32 %v396_v56, %v1495_v53  ;;  %v668_v21 = vmul.f32 %v1477_v54, %v1477_v54  ;;  %v679_v54 = vmul.f32 %v1479_v55, %v1479_v55 }
  0x93   : > { %vm706_vm7 = vcmp.eq.s32.totalorder %v1495_v53, 0 }
  0x94   : > { %v398_v0 = vadd.s32 %v396_v56, %v395_v59  ;;  %vm399_vm0 = vcmp.lt.s32.totalorder %v397_v61, 32 }
  0x96   : > { %601 = vadd.xlane.f32.xlu0 %v600_v22  ;;  %vm400_vm1 = vcmp.lt.s32.totalorder %v398_v0, 32 }
  0x9a   : > { %625 = vadd.xlane.f32.xlu0 %v624_v24 }
 0x115   : > { %v518_v25 = vpop.xlane.xlu1 %517 }
 0x116   : > { %v521_v27 = vmul.f32 %v518_v25, %v452_v26 }
 0x118   : > { %v523_v29 = vadd.f32 %v521_v27, %v455_v28  ;;  %v449_v30 = vpop.xlane.xlu0 %448  ;;  %v657_v27 = vmul.f32 %v1489_v15, %v1489_v15 }
 0x119   : > { %v453_v31 = vmul.f32 %v452_v26, %v449_v30 }
 0x11a   : > { %v889_v32 = vmul.f32 -1.442695, %v523_v29  ;;  %v520_v33 = vpop.xlane.xlu1 %519 }
 0x11b   : > { %v456_v34 = vadd.f32 %v455_v28, %v453_v31  ;;  %v522_v35 = vmul.f32 %v520_v33, %v452_v26 }
 0x11c   : > { %1087 = vpow2.f32 %v889_v32 }
 0x11d   : > { %v524_v36 = vadd.f32 %v522_v35, %v455_v28  ;;  %v877_v37 = vmul.f32 -1.442695, %v456_v34 }
 0x11e   : > { %v637_v30 = vpop.xlane.xlu1 %636 }
 0x11f   : > { %v890_v38 = vmul.f32 -1.442695, %v524_v36  ;;  %v451_v39 = vpop.xlane.xlu0 %450  ;;  %v638_v34 = vrot.slane %v637_v30, 4 }
 0x120   : > { %v454_v40 = vmul.f32 %v452_v26, %v451_v39 }
 0x121   : > { %1089 = vpow2.f32 %v890_v38  ;;  %v639_v15 = vadd.f32 %v638_v34, %v637_v30 }
 0x122   : > { %v457_v41 = vadd.f32 %v455_v28, %v454_v40  ;;  %1091 = vpow2.f32 %v877_v37 }
 0x123   : > { %v602_v42 = vpop.xlane.xlu0 %601 }
 0x124   : > { %v878_v43 = vmul.f32 -1.442695, %v457_v41  ;;  %v603_v44 = vmul.f32 %v602_v42, %v452_v26 }
 0x126   : > { %v1088_v45 = vpop.eup %1087  ;;  %1093 = vpow2.f32 %v878_v43  ;;  %v604_v46 = vadd.f32 %v603_v44, %v455_v28 }
 0x127   : > { %v531_v47 = vadd.f32 1.0, %v1088_v45  ;;  %v626_v28 = vpop.xlane.xlu0 %625 }
 0x128   : > { %v892_v48 = vmul.f32 -1.442695, %v604_v46  ;;  %v627_v33 = vrot.slane %v626_v28, 4 }
 0x129   : > { %1095 = vrcp.f32 %v531_v47 }
 0x12a   : > { %1097 = vpow2.f32 %v892_v48  ;;  %v628_v40 = vadd.f32 %v627_v33, %v626_v28 }
 0x12b   : > { %v1090_v50 = vpop.eup %1089 }
 0x12c   : > { %v532_v51 = vadd.f32 1.0, %v1090_v50  ;;  %v1092_v52 = vpop.eup %1091  ;;  %v629_v47 = vrot.slane %v628_v40, 2  ;;  %v640_v50 = vrot.slane %v639_v15, 2 }
 0x12d   : > { %v464_v58 = vadd.f32 1.0, %v1092_v52 }
 0x12e   : > { %1099 = vrcp.f32 %v532_v51 }
 0x130   : > { %v1094_v57 = vpop.eup %1093 }
 0x131   : > { %v465_v60 = vadd.f32 1.0, %v1094_v57 }
 0x133   : > { %v1096_v62 = vpop.eup %1095  ;;  %1101 = vrcp.f32 %v465_v60 }
 0x134   : > { %v1098_v63 = vpop.eup %1097  ;;  %1103 = vrcp.f32 %v464_v58  ;;  %v559_v1 = vmul.f32 %v1096_v62, %v1096_v62  ;;  %v630_v62 = vadd.f32 %v629_v47, %v628_v40 }
 0x135   : > { %v608_v2 = vadd.f32 1.0, %v1098_v63 }
 0x136   : > { %v561_v3 = vsel %vm399_vm0, %v559_v1, 0.0  ;;  %v641_v1 = vadd.f32 %v640_v50, %v639_v15 }
 0x137   : > { %1105 = vrcp.f32 %v608_v2  ;;  %v563_v6 = vsel %vm542_vm2, %v561_v3, 0.0 }
 0x138   : > { %v1100_v4 = vpop.eup %1099 }
 0x139   : > { %v560_v5 = vmul.f32 %v1100_v4, %v1100_v4 }
 0x13b   : > { %v562_v7 = vsel %vm400_vm1, %v560_v5, 0.0 }
 0x13c   : > { %v564_v8 = vsel %vm542_vm2, %v562_v7, 0.0 }
 0x13d   : > { %v1102_v10 = vpop.eup %1101  ;;  %v565_v11 = vadd.f32 %v564_v8, %v563_v6 }
 0x13e   : > { %v1104_v12 = vpop.eup %1103  ;;  %v539_v16 = vmul.f32 %v1102_v10, %v1102_v10 }
 0x13f   : > { %566 = vadd.xlane.f32.xlu0 %v565_v11  ;;  %v538_v18 = vmul.f32 %v1104_v12, %v1104_v12  ;;  %v631_v11 = vrot.slane %v630_v62, 1 }
 0x140   : > { %v541_v20 = vsel %vm400_vm1, %v539_v16, 0.0 }
 0x141   : > { %v1106_v17 = vpop.eup %1105  ;;  %v540_v23 = vsel %vm399_vm0, %v538_v18, 0.0  ;;  %v544_v25 = vsel %vm542_vm2, %v541_v20, 0.0 }
 0x142   : > { %v612_v19 = vsub.f32 %v1106_v17, %v611_v13  ;;  %v543_v9 = vsel %vm542_vm2, %v540_v23, 0.0 }
 0x143   : > { %647 = vadd.xlane.f32.xlu0 %v646_v14  ;;  %v545_v26 = vadd.f32 %v544_v25, %v543_v9  ;;  %v642_v14 = vrot.slane %v641_v1, 1 }
 0x144   : > { %v613_v22 = vmul.f32 %v612_v19, %v612_v19 }
 0x145   : > { %v643_v25 = vadd.f32 %v642_v14, %v641_v1 }
 0x146   : > { %v614_v24 = vsel %vm542_vm2, %v613_v22, 0.0  ;;  %v632_v22 = vadd.f32 %v631_v11, %v630_v62 }
 0x147   : > { %615 = vadd.xlane.f32.xlu1 %v614_v24  ;;  %669 = vadd.xlane.f32.xlu0 %v668_v21 }
 0x14b   : > { %546 = vadd.xlane.f32.xlu1 %v545_v26 }
 0x14f   : > { %658 = vadd.xlane.f32.xlu1 %v657_v27 }
 0x153   : > { %680 = vadd.xlane.f32.xlu1 %v679_v54 }
 0x1cc   : > { %v567_v29 = vpop.xlane.xlu0 %566 }
 0x1cd   : > { %v568_v31 = vrot.slane %v567_v29, 4 }
 0x1cf   : > { %v569_v35 = vadd.f32 %v568_v31, %v567_v29  ;;  %v691_v29 = vand.u32 127, %v393_v49 }
 0x1d0   : > { %v648_v32 = vpop.xlane.xlu0 %647 }
 0x1d1   : > { %v649_v37 = vrot.slane %v648_v32, 4  ;;  %v570_v43 = vrot.slane %v569_v35, 2  ;;  %vm697_vm3 = vcmp.eq.s32.totalorder %v691_v29, 3  ;;  %vm696_vm4 = vcmp.eq.s32.totalorder %v691_v29, 2 }
 0x1d2   : > { %vm694_vm5 = vcmp.eq.s32.totalorder %v691_v29, 1  ;;  %vm692_vm6 = vcmp.eq.s32.totalorder %v691_v29, 0 }
 0x1d3   : > { %v650_v44 = vadd.f32 %v649_v37, %v648_v32  ;;  %v571_v57 = vadd.f32 %v570_v43, %v569_v35 }
 0x1d4   : > { %v616_v36 = vpop.xlane.xlu1 %615  ;;  %v670_v38 = vpop.xlane.xlu0 %669 }
 0x1d5   : > { %v617_v39 = vrot.slane %v616_v36, 4  ;;  %v671_v41 = vrot.slane %v670_v38, 4  ;;  %v651_v52 = vrot.slane %v650_v44, 2  ;;  %v572_v3 = vrot.slane %v571_v57, 1 }
 0x1d7   : > { %v618_v42 = vadd.f32 %v617_v39, %v616_v36  ;;  %v672_v48 = vadd.f32 %v671_v41, %v670_v38  ;;  %v652_v4 = vadd.f32 %v651_v52, %v650_v44  ;;  %v573_v17 = vadd.f32 %v572_v3, %v571_v57 }
 0x1d8   : > { %v547_v55 = vpop.xlane.xlu1 %546 }
 0x1d9   : > { %v619_v45 = vrot.slane %v618_v42, 2  ;;  %v548_v46 = vrot.slane %v547_v55, 4  ;;  %v673_v61 = vrot.slane %v672_v48, 2  ;;  %v653_v18 = vrot.slane %v652_v4, 1 }
 0x1db   : > { %v549_v51 = vadd.f32 %v548_v46, %v547_v55  ;;  %v620_v60 = vadd.f32 %v619_v45, %v618_v42  ;;  %v674_v10 = vadd.f32 %v673_v61, %v672_v48  ;;  %v654_v26 = vadd.f32 %v653_v18, %v652_v4 }
 0x1dc   : > { %v659_v56 = vpop.xlane.xlu1 %658 }
 0x1dd   : > { %v550_v58 = vrot.slane %v549_v51, 2  ;;  %v660_v59 = vrot.slane %v659_v56, 4  ;;  %v621_v8 = vrot.slane %v620_v60, 1  ;;  %v675_v23 = vrot.slane %v674_v10, 1 }
 0x1df   : > { %v661_v63 = vadd.f32 %v660_v59, %v659_v56  ;;  %v551_v0 = vadd.f32 %v550_v58, %v549_v51  ;;  %v622_v20 = vadd.f32 %v621_v8, %v620_v60  ;;  %v676_v54 = vadd.f32 %v675_v23, %v674_v10 }
 0x1e0   : > { %v681_v2 = vpop.xlane.xlu1 %680 }
 0x1e1   : > { %v662_v5 = vrot.slane %v661_v63, 2  ;;  %v682_v6 = vrot.slane %v681_v2, 4  ;;  %v552_v7 = vrot.slane %v551_v0, 1 }
 0x1e3   : > { %v683_v12 = vadd.f32 %v682_v6, %v681_v2  ;;  %v553_v13 = vadd.f32 %v552_v7, %v551_v0  ;;  %v663_v16 = vadd.f32 %v662_v5, %v661_v63 }
 0x1e5   : > { %v684_v19 = vrot.slane %v683_v12, 2  ;;  %961 = vpush %v553_v13  ;;  %v664_v21 = vrot.slane %v663_v16, 1 }
 0x1e6   : > { %963 = vpush %v573_v17 }
 0x1e7   : > { %v685_v24 = vadd.f32 %v684_v19, %v683_v12  ;;  %965 = vpush %v622_v20  ;;  %v665_v9 = vadd.f32 %v664_v21, %v663_v16 }
 0x1e8   : > { %967 = vpush %v632_v22 }
 0x1e9   : > { %969 = vpush %v643_v25  ;;  %v686_v27 = vrot.slane %v685_v24, 1 }
 0x1ea   : > { %971 = vpush %v654_v26 }
 0x1eb   : > { %973 = vpush %v665_v9  ;;  %v687_v28 = vadd.f32 %v686_v27, %v685_v24 }
 0x1ec   : > { %975 = vpush %v676_v54 }
 0x1ed   : > { %977 = vpush %v687_v28 }
 0x216   : > { %s1519_s11 = spop %961 }
 0x217   : > { %s964_s0 = spop %963  ;;  %v704_v49 = vstv %s1519_s11  ;;  %s1258_s11 = smov [#allocation11]  }
 0x218   : > { %s966_s2 = spop %965  ;;  %v702_v33 = vstv %s964_s0  ;;  %s1150_s0 = scalar_lea.vmem %s1531_s16, 128 }
 0x219   : > { %s968_s25 = spop %967  ;;  %v700_v31 = vstv %s966_s2  ;;  %p1151_p5 = scmp.ne.s32.totalorder %s1531_s16, %s1150_s0 }
 0x21a   : > { %s970_s15 = spop %969  ;;  %s1154_s2 = sshll.u32 %s1258_s11, 4  ;;  %s1155_s2 = int_to_ptr.vmem [resolvable:$false] %s1154_s2 }
 0x21b   : > { %s645_s13 = sadd.f32 %s970_s15, %s968_s25  ;;  %s972_s14 = spop %971 }
 0x21c   : > { %s974_s10 = spop %973  ;;  %p1152_p4 = pnand %p1151_p5, %p1610_p8 }
 0x21d   : > { %s656_s4 = sadd.f32 %s972_s14, %s645_s13  ;;  %s976_s28 = spop %975 }
 0x21e   : > { %s978_s27 = spop %977  ;;  %s1529_s13 = scalar_lea.hbm %s1583_s5, %s895_s12 }
 0x21f   : > { %s667_s29 = sadd.f32 %s974_s10, %s656_s4  ;;  %p1153_p9 = pneg %p1152_p4 }
 0x220   : > { %s1156_s14 = scalar_lea.vmem %s1155_s2, 256  ;;  %p1157_p11 = scmp.lt.s32.totalorder %s1531_s16, %s1155_s2 }
 0x221   : > { %s678_s24 = sadd.f32 %s976_s28, %s667_s29  ;;  %p1158_p0 = scmp.lt.s32.totalorder %s1156_s14, %s1150_s0 }
 0x223   : > { %s689_s30 = sadd.f32 %s978_s27, %s678_s24  ;;  %p1159_p6 = por %p1158_p0, %p1157_p11 }
 0x225   : > { %v698_v30 = vstv %s689_s30  ;;  %p1160_p2 = pnand %p1159_p6, %p1153_p9 }
 0x226   : > { %v699_v32 = vsel %vm697_vm3, %v698_v30, 0.0 }
 0x227   : > { %v701_v34 = vsel %vm696_vm4, %v700_v31, %v699_v32 }
 0x228   : > { %v703_v35 = vsel %vm694_vm5, %v702_v33, %v701_v34 }
 0x229   : > { %v705_v36 = vsel %vm692_vm6, %v704_v49, %v703_v35 }
 0x22a   : > { %v707_v37 = vsel %vm706_vm7, %v705_v36, 0.0 }
 0x22b   : > { %708 = vst [vmem:[%s376_s17] sm:$0xff] %v707_v37 }
 0x22c   : > { %1163 = shalt.err (!%p1160_p2)
}
 0x22d   : > { %s1164_s26 = scalar_lea.hbm %s1529_s13, 128  ;;  %s1168_s29 = scalar_lea.hbm %s1583_s5, 256 }
 0x22e   : > { %p1165_p10 = scmp.ne.s32.totalorder %s1529_s13, %s1164_s26  ;;  %p1169_p1 = scmp.lt.u32.totalorder %s1529_s13, %s1583_s5 }
 0x22f   : > { %p1170_p3 = scmp.lt.u32.totalorder %s1168_s29, %s1164_s26  ;;  %p1172_p4 = scmp.lt.u32.totalorder %s1164_s26, %s1529_s13 }
 0x230   : > { %p1166_p12 = pnand %p1165_p10, %p1610_p8 }
 0x231   : > { %p1171_p5 = por %p1170_p3, %p1169_p1 }
 0x232   : > { %p1167_p13 = pneg %p1166_p12 }
 0x233   : > { %p1173_p9 = por %p1172_p4, %p1171_p5 }
 0x235   : > { %p1174_p11 = pnand %p1173_p9, %p1167_p13 }
 0x237   : > { %1177 = shalt.err (!%p1174_p11)
}
 0x238   : > { %1005 = dma.vmem_to_hbm [thread:$0]  (%p1610_p8), %s1531_s16, 128, %s1529_s13, %s710_s21  }
 0x239 PF: > { %s735_s9 = sand.u32 1, %s1220_s18   ;;  %p1611_p0 = scmp.ne.s32.totalorder %s1597_s8, 0 }
 0x23a   : > { %s736_s24 = scalar_lea.sflag [#allocation5], %s735_s9 }
 0x23b   : > { %p1015_p6 = pnand %p852_p7, %p1611_p0 }
 0x23d   : > { %1215 = dma.done.wait (!%p1015_p6), %s736_s24, 128  }
 0x23e   : > { %1217 = vsyncadd (!%p1015_p6), %s736_s24, 4294967168  ;;  %s23_s23 = sadd.s32 1, %s1240_s23   ;;  %s1612_s6 = sld [smem:[#allocation22_spill]] }
 0x23f   : > { %p20_p2 = scmp.ge.s32.totalorder %s23_s23, 4   ;;  %s1613_s18 = smov %s1224_s19 }
 0x240   : > { %s1614_s19 = smov %s1228_s20  ;;  %s1615_s20 = smov %s1351_s7 }
 0x241   : > { %s1616_s21 = smov %s1236_s22  ;;  %22 = sbr.rel (!%p20_p2) target bundleno = 12 (0xc), region = 143 }
 0x244   : > { %s1617_s22 = smov %s1612_s6 }
 0x248   :  { %741 = vsyncpa [#allocation4], 1 }
 0x249   :  { %743 = vsyncpa [#allocation4 + $0x1], 1 }
 0x24a   :  { %744 = vsyncpa [#allocation8], 1 }
 0x24b   :  { %746 = vsyncpa [#allocation8 + $0x1], 1 }
 0x24c   :  { %747 = vsyncpa [#allocation5], 1 }
 0x24d   :  { %749 = vsyncpa [#allocation5 + $0x1], 1 }
 0x24e   :  { %750 = vsyncpa [#allocation6], 1 }
 0x24f   :  { %752 = vsyncpa [#allocation6 + $0x1], 1 }

</bundles_post_ra>
